<compile_context>
chip_gen: v5e
topology: v5e:2x2
jax: 0.10.0
libtpu: 0.0.40
codegen_flags: <defaults>
</compile_context>

<pallas_src>
import jax
import jax.numpy as jnp
from jax.experimental import pallas as pl
from jax.experimental.pallas import tpu as pltpu


_LANE = 512              # trailing dim: lane-dense, multiple of 128
_TARGET_BLOCK_ROWS = 1024  # 1024 x 512 f32 out = 2 MiB per grid step


def _cast_kernel(x_ref, o_ref):
    # elementwise cast to float32 (VPU)
    o_ref[...] = x_ref[...].astype(jnp.float32)


def _round_up(n, m):
    return ((n + m - 1) // m) * m


def tofp32(x):
    """Cast any-dtype array to float32 via a Pallas TPU kernel.

    Mirrors torch.Tensor.float(): same shape, dtype becomes float32.
    """
    orig_shape = x.shape
    total = x.size

    if total == 0:
        return jnp.zeros(orig_shape, dtype=jnp.float32)

    itemsize = jnp.dtype(x.dtype).itemsize
    # native packed-sublane tile: 8 rows for 32-bit, 16 for 16-bit, 32 for 8-bit
    packing = max(8, 32 // max(itemsize, 1))

    rows_needed = -(-total // _LANE)  # ceil

    if rows_needed >= 2 * _TARGET_BLOCK_ROWS:
        block_rows = _TARGET_BLOCK_ROWS
    elif rows_needed > packing:
        # medium inputs: aim for >= 2 grid steps so v7x can shard across its
        # two TensorCores; keep the block a multiple of the packed tile.
        block_rows = min(
            _TARGET_BLOCK_ROWS,
            _round_up(-(-rows_needed // 2), packing),
        )
    else:
        # tiny input: one packed block
        block_rows = _round_up(rows_needed, packing)

    rows = _round_up(rows_needed, block_rows)
    padded = rows * _LANE

    x_flat = x.reshape(-1)
    if padded != total:
        x_flat = jnp.pad(x_flat, (0, padded - total))
    x2d = x_flat.reshape(rows, _LANE)

    grid = (rows // block_rows,)

    out2d = pl.pallas_call(
        _cast_kernel,
        out_shape=jax.ShapeDtypeStruct((rows, _LANE), jnp.float32),
        grid=grid,
        in_specs=[pl.BlockSpec((block_rows, _LANE), lambda i: (i, 0))],
        out_specs=pl.BlockSpec((block_rows, _LANE), lambda i: (i, 0)),
        compiler_params=pltpu.CompilerParams(
            dimension_semantics=("parallel",),
            vmem_limit_bytes=32 << 20,
        ),
        cost_estimate=pl.CostEstimate(
            flops=0,
            transcendentals=0,
            bytes_accessed=padded * (itemsize + 4),
        ),
    )(x2d)

    out_flat = out2d.reshape(-1)
    if padded != total:
        out_flat = out_flat[:total]
    return out_flat.reshape(orig_shape)


if __name__ == "__main__":
    key = jax.random.PRNGKey(0)

    # NCHW input, small shapes, non-fp32 dtype so the cast is meaningful.
    x = jax.random.normal(key, (2, 4, 16, 16), dtype=jnp.bfloat16)
    y = tofp32(x)
    jax.block_until_ready(y)

    ref = x.astype(jnp.float32)
    assert y.dtype == jnp.float32, y.dtype
    assert y.shape == x.shape, y.shape
    assert bool(jnp.all(y == ref)), "mismatch vs reference cast"

    # Odd-sized input exercises the pad-and-tile path.
    x_odd = jax.random.normal(jax.random.PRNGKey(1), (3, 5, 7), dtype=jnp.float16)
    y_odd = tofp32(x_odd)
    jax.block_until_ready(y_odd)
    ref_odd = x_odd.astype(jnp.float32)
    assert y_odd.dtype == jnp.float32, y_odd.dtype
    assert y_odd.shape == x_odd.shape, y_odd.shape
    assert bool(jnp.all(y_odd == ref_odd)), "mismatch vs reference cast (odd shape)"

    print("KERNEL_OK")
</pallas_src>

<mosaic_0001>
module attributes {stable_mosaic.version = 11 : i64} {
  func.func @_cast_kernel(%arg0: i32, %arg1: memref<16x512xbf16, #tpu.memory_space<vmem>>, %arg2: memref<16x512xf32, #tpu.memory_space<vmem>>) attributes {dimension_semantics = [#tpu.dimension_semantics<parallel>], iteration_bounds = array<i64: 1>, scalar_prefetch = 0 : i64, scratch_operands = 0 : i64, tpu.core_type = #tpu.core_type<tc>, window_params = [{transform_indices = @transform_0, window_bounds = array<i64: 16, 512>}, {transform_indices = @transform_1, window_bounds = array<i64: 16, 512>}]} {
    %c0 = arith.constant 0 : index
    %c0_0 = arith.constant 0 : index
    %0 = vector.load %arg1[%c0, %c0_0] : memref<16x512xbf16, #tpu.memory_space<vmem>>, vector<16x512xbf16>
    %1 = arith.extf %0 : vector<16x512xbf16> to vector<16x512xf32>
    %c0_1 = arith.constant 0 : index
    %c0_2 = arith.constant 0 : index
    %2 = vector.load %arg2[%c0_1, %c0_2] : memref<16x512xf32, #tpu.memory_space<vmem>>, vector<16x512xf32>
    tpu.vector_store %arg2[%c0_1, %c0_2], %1 {strides = array<i32>} : memref<16x512xf32, #tpu.memory_space<vmem>>, vector<16x512xf32>,
    return
  }
  func.func @transform_0(%arg0: i32) -> (i32, i32) {
    %c0_i32 = arith.constant 0 : i32
    %c0_i32_0 = arith.constant 0 : i32
    return %arg0, %c0_i32 : i32, i32
  }
  func.func @transform_1(%arg0: i32) -> (i32, i32) {
    %c0_i32 = arith.constant 0 : i32
    %c0_i32_0 = arith.constant 0 : i32
    return %arg0, %c0_i32 : i32, i32
  }
}

</mosaic_0001>

<bundles_post_ra>
// kernel: tpu_custom_call.1
= control target key start
LH: loop header
LB: loop body
LE: loop exit
PB: predicated region body
PF: predicated region fallthrough
CT: control target
= control target key end

     0   :  { %6 = vsyncpa [#allocation3], 0  ;;  %s144_s0 = inlined_call_operand.hbm [shape: bf16[16,512], index: 0, kind: input, shape index: {}]   ;;  %s145_s1 = inlined_call_operand.hbm [shape: f32[16,512], index: 1, kind: output, shape index: {}]  }
   0x1   :  { %7 = vsyncpa [#allocation4], 0  ;;  %s12_s8 = sshll.u32 %s144_s0, 4  ;;  %s122_s9 = smov [#allocation2]   ;;  %s13_s8 = int_to_ptr.hbm [resolvable:$true] %s12_s8 }
   0x2   :  { %s14_s10 = sshll.u32 %s122_s9, 4  ;;  %s123_s11 = smov 256   ;;  %s15_s10 = int_to_ptr.vmem [resolvable:$true] %s14_s10 }
   0x3   :  { %s124_s12 = smov 16  }
   0x4   :  { %20 = dma.hbm_to_vmem [thread:$0]  %s13_s8, 512, %s15_s10, [#allocation3], %s123_s11, %s123_s11, %s124_s12  }
   0x5   :  { %118 = dma.done.wait [#allocation3], 512  }
   0x6   :  { %119 = vsyncadd [#allocation3], 4294966784  ;;  %v25_v0 = vld [vmem:[#allocation2] sm:$0xff]  ;;  %v26_v1 = vld [vmem:[#allocation2 + $0x8] sm:$0xff]  ;;  %s125_s0 = smov [#allocation5]   ;;  %s51_s16 = sshll.u32 %s145_s1, 4  ;;  %s52_s16 = int_to_ptr.hbm [resolvable:$true] %s51_s16 }
   0x7   :  { %v27_v2 = vld [vmem:[#allocation2 + $0x10] sm:$0xff]  ;;  %v29_v3 = vunpack.c.l.bf16 %v25_v0  ;;  %v30_v4 = vunpack.c.h.bf16 %v25_v0  ;;  %v31_v5 = vunpack.c.l.bf16 %v26_v1  ;;  %v32_v6 = vunpack.c.h.bf16 %v26_v1  ;;  %v28_v7 = vld [vmem:[#allocation2 + $0x18] sm:$0xff]  ;;  %s49_s13 = sshll.u32 %s125_s0, 4  ;;  %s126_s17 = smov 512   ;;  %s50_s13 = int_to_ptr.vmem [resolvable:$true] %s49_s13 }
   0x8   :  { %v33_v8 = vunpack.c.l.bf16 %v27_v2  ;;  %v34_v9 = vunpack.c.h.bf16 %v27_v2  ;;  %v35_v10 = vunpack.c.l.bf16 %v28_v7  ;;  %v36_v11 = vunpack.c.h.bf16 %v28_v7  ;;  %s127_s18 = smov 32  }
   0x9   :  { %37 = vst [vmem:[#allocation5] sm:$0xff] %v29_v3 }
   0xa   :  { %38 = vst [vmem:[#allocation5 + $0x8] sm:$0xff] %v30_v4 }
   0xb   :  { %39 = vst [vmem:[#allocation5 + $0x10] sm:$0xff] %v31_v5 }
   0xc   :  { %40 = vst [vmem:[#allocation5 + $0x18] sm:$0xff] %v32_v6 }
   0xd   :  { %41 = vst [vmem:[#allocation5 + $0x20] sm:$0xff] %v33_v8 }
   0xe   :  { %42 = vst [vmem:[#allocation5 + $0x28] sm:$0xff] %v34_v9 }
   0xf   :  { %43 = vst [vmem:[#allocation5 + $0x30] sm:$0xff] %v35_v10 }
  0x10   :  { %44 = vst [vmem:[#allocation5 + $0x38] sm:$0xff] %v36_v11 }
  0x11   :  { %57 = dma.vmem_to_hbm [thread:$0]  %s50_s13, 1024, %s52_s16, [#allocation4], %s126_s17, %s126_s17, %s127_s18  }
  0x12   :  { %120 = dma.done.wait [#allocation4], 1024  }
  0x13   :  { %121 = vsyncadd [#allocation4], 4294966272 }
  0x14   :  { %62 = vsyncpa [#allocation3], 1 }
  0x15   :  { %63 = vsyncpa [#allocation4], 1 }

</bundles_post_ra>
